<compile_context>
chip_gen: v7x
topology: tpu7x:2x2x1
jax: 0.10.0
libtpu: 0.0.40
codegen_flags: <defaults>
</compile_context>

<pallas_src>
import functools

import jax
import jax.numpy as jnp
from jax.experimental import pallas as pl
from jax.experimental.pallas import tpu as pltpu


def _round_up(x, m):
    return (x + m - 1) // m * m


def _drop_last_linear_kernel(x_ref, w_ref, b_ref, o_ref, *, compute_dtype):
    # x_ref: (TT, H_in)   native-dtype activation tile (one batch, one time tile)
    # w_ref: (H_in, TN)   resident pre-transposed compute-dtype weight strip
    # b_ref: (1, TN)      resident f32 bias strip
    # o_ref: (TT, TN)     output tile
    #
    # In-kernel cast (VPU) hides under the input DMA; the MXU accumulates in f32 and
    # the bias is added once in f32 before the single store-time cast.
    x = x_ref[...].astype(compute_dtype)
    acc = jnp.dot(x, w_ref[...], preferred_element_type=jnp.float32)
    o_ref[...] = (acc + b_ref[...]).astype(o_ref.dtype)


def temporal_drop_last_linear(x, w, b, *, time_tile=512, out_dtype=None,
                              compute_dtype=jnp.bfloat16):
    """net(x[:, :-1, :]) with net = Linear(H_in, H_out) (torch layout w: (H_out, H_in)).

    x: (B, T, H_in), w: (H_out, H_in), b: (H_out,)  ->  (B, T-1, H_out) in out_dtype
    (default x.dtype).  Contract: the MXU is fed in `compute_dtype` (bf16) with f32
    accumulation, so expect ~1e-2 relative error vs a full-f32 reference.
    """
    B, T, H_in = x.shape
    H_out = w.shape[0]
    assert T >= 2, "need at least 2 timesteps to drop the last one"
    out_dtype = x.dtype if out_dtype is None else out_dtype

    itemsize_x = jnp.dtype(x.dtype).itemsize
    itemsize_o = jnp.dtype(out_dtype).itemsize
    itemsize_c = jnp.dtype(compute_dtype).itemsize

    # Pre-transpose the weight ONCE -> (H_in, H_out); tiny one-time pass vs. the
    # activation traffic.  Bias kept in f32 for the accumulator add.
    w_t = jnp.swapaxes(w, 0, 1).astype(compute_dtype)
    b2 = b.astype(jnp.float32).reshape(1, H_out)

    # ---- VMEM budgeting (conservative across v5e/v6e 128 MiB and v7x 64 MiB). ----
    # Pallas double-buffers every operand, including the constant-index weight/bias.
    BUDGET = 48 << 20

    def footprint(tt, tn):
        w_b = 2 * H_in * tn * itemsize_c      # resident weight strip (x2 buffers)
        b_b = 2 * tn * 4                      # resident bias strip
        x_b = 2 * tt * H_in * itemsize_x      # pipelined activation tile
        o_b = 2 * tt * tn * itemsize_o        # pipelined output tile
        return w_b + b_b + x_b + o_b

    # Output-feature (N) tiling: keep the whole weight resident when it fits,
    # otherwise fall back to 128-lane-multiple strips of it.
    TN = H_out
    while TN > 128 and footprint(8, TN) > BUDGET:
        TN = max(128, _round_up(TN // 2, 128))
    n_n = pl.cdiv(H_out, TN)
    # TODO(synk): for H_in large enough that even a (H_in, 128) strip overflows VMEM,
    # add a K grid axis ("arbitrary", last) with an f32 accumulator + pl.when finalize.

    # Time tiling over the KEPT T-1 rows (multiples of 8 sublanes); as large as the
    # budget allows -- big tiles amortize the ~0.35 us/grid-step overhead.
    TT = min(_round_up(max(time_tile, 8), 8), _round_up(T - 1, 8))
    while TT > 8 and footprint(TT, TN) > BUDGET:
        TT = max(8, _round_up(TT // 2, 8))
    n_tt = pl.cdiv(T - 1, TT)

    # v7x has 2 TensorCores: guarantee >=2 programs when the shape allows it.
    if B * n_n * n_tt < 2 and (T - 1) > 8:
        TT = _round_up(pl.cdiv(T - 1, 2), 8)
        n_tt = pl.cdiv(T - 1, TT)

    # NOTE(correctness): the x block for the last time tile reads rows at/after index
    # T-1 (the dropped timestep, and possibly past the end of x when TT does not
    # divide T-1).  This is safe ONLY because the output has T-1 rows, so Pallas masks
    # those rows on store.  Preserve this invariant if this ever moves to manual DMA.
    # TODO(synk): when T-1 < 8 and B is large, block over batch (Bt, T-1, H) instead
    # of squeezing it, to amortize per-step overhead; not needed at shapes used here.
    grid = (B, n_n, n_tt)

    kernel = functools.partial(_drop_last_linear_kernel, compute_dtype=compute_dtype)

    cost = pl.CostEstimate(
        flops=2 * B * (T - 1) * H_in * H_out,
        transcendentals=0,
        bytes_accessed=(B * n_n * (T - 1) * H_in * itemsize_x
                        + H_in * H_out * itemsize_c + H_out * 4
                        + B * (T - 1) * H_out * itemsize_o),
    )

    return pl.pallas_call(
        kernel,
        out_shape=jax.ShapeDtypeStruct((B, T - 1, H_out), out_dtype),
        grid=grid,
        in_specs=[
            # x: one batch, one TT-row time tile per step, streamed at native width.
            pl.BlockSpec((None, TT, H_in), lambda bi, ni, ti: (bi, ti, 0)),
            # weight strip: constant within the inner (time) loop -> resident in VMEM.
            pl.BlockSpec((H_in, TN), lambda bi, ni, ti: (0, ni)),
            # bias strip: resident as well.
            pl.BlockSpec((1, TN), lambda bi, ni, ti: (0, ni)),
        ],
        out_specs=pl.BlockSpec((None, TT, TN), lambda bi, ni, ti: (bi, ti, ni)),
        compiler_params=pltpu.CompilerParams(
            # All grid axes index disjoint output tiles -> shardable across the two
            # v7x TensorCores; harmless on single-TC v5e/v6e.
            dimension_semantics=("parallel", "parallel", "parallel"),
            vmem_limit_bytes=int(min(64 << 20,
                                     max(32 << 20, footprint(TT, TN) + (4 << 20)))),
        ),
        cost_estimate=cost,
    )(x, w_t, b2)


if __name__ == "__main__":
    B, T, H = 2, 8, 32

    key = jax.random.PRNGKey(0)
    kx, kw, kb = jax.random.split(key, 3)

    x = jax.random.normal(kx, (B, T, H), dtype=jnp.float32)
    # Deterministic "net" parameters (Linear(H, H)), torch.nn.Linear-style shapes.
    w = jax.random.normal(kw, (H, H), dtype=jnp.float32) * 0.05
    b = jax.random.normal(kb, (H,), dtype=jnp.float32) * 0.05

    out = jax.block_until_ready(temporal_drop_last_linear(x, w, b))

    # Plain-JAX reference (same semantics as the PyTorch module with a Linear net).
    ref = jnp.einsum("bth,oh->bto", x[:, :-1, :], w) + b[None, None, :]
    assert out.shape == (B, T - 1, H)
    assert out.dtype == x.dtype
    # Kernel feeds the MXU in bf16 (f32 accumulation) -> bf16-appropriate tolerance
    # against the full-f32 reference.
    assert jnp.allclose(out, ref, atol=2e-2, rtol=2e-2), float(
        jnp.max(jnp.abs(out - ref)))

    print("KERNEL_OK")
</pallas_src>

<mosaic_0001>
module attributes {stable_mosaic.version = 11 : i64} {
  func.func @_drop_last_linear_kernel(%arg0: i32, %arg1: i32, %arg2: i32, %arg3: memref<1x8x32xf32, #tpu.memory_space<vmem>>, %arg4: memref<32x32xbf16, #tpu.memory_space<vmem>>, %arg5: memref<1x32xf32, #tpu.memory_space<vmem>>, %arg6: memref<1x8x32xf32, #tpu.memory_space<vmem>>) attributes {dimension_semantics = [#tpu.dimension_semantics<parallel>, #tpu.dimension_semantics<parallel>, #tpu.dimension_semantics<parallel>], iteration_bounds = array<i64: 2, 1, 1>, scalar_prefetch = 0 : i64, scratch_operands = 0 : i64, tpu.core_type = #tpu.core_type<tc>, window_params = [{transform_indices = @transform_0, window_bounds = array<i64: 1, 8, 32>}, {transform_indices = @transform_1, window_bounds = array<i64: 32, 32>}, {transform_indices = @transform_2, window_bounds = array<i64: 1, 32>}, {transform_indices = @transform_3, window_bounds = array<i64: 1, 8, 32>}]} {
    %c0 = arith.constant 0 : index
    %c0_0 = arith.constant 0 : index
    %c0_1 = arith.constant 0 : index
    %0 = vector.load %arg3[%c0, %c0_0, %c0_1] : memref<1x8x32xf32, #tpu.memory_space<vmem>>, vector<1x8x32xf32>
    %1 = vector.shape_cast %0 : vector<1x8x32xf32> to vector<8x32xf32>
    %2 = arith.truncf %1 : vector<8x32xf32> to vector<8x32xbf16>
    %c0_2 = arith.constant 0 : index
    %c0_3 = arith.constant 0 : index
    %3 = vector.load %arg4[%c0_2, %c0_3] : memref<32x32xbf16, #tpu.memory_space<vmem>>, vector<32x32xbf16>
    %cst = arith.constant dense<0.000000e+00> : vector<8x32xf32>
    %4 = tpu.matmul %2, %3, %cst {dimension_numbers = #tpu.dot_dimension_numbers<[1], [0], [0], [1], [0, 0, 1, 1], [], []>} : vector<8x32xbf16>, vector<32x32xbf16>, vector<8x32xf32> -> vector<8x32xf32>
    %c0_4 = arith.constant 0 : index
    %c0_5 = arith.constant 0 : index
    %5 = vector.load %arg5[%c0_4, %c0_5] : memref<1x32xf32, #tpu.memory_space<vmem>>, vector<1x32xf32>
    %6 = vector.broadcast %5 : vector<1x32xf32> to vector<8x32xf32>
    %7 = arith.addf %4, %6 : vector<8x32xf32>
    %c0_6 = arith.constant 0 : index
    %c0_7 = arith.constant 0 : index
    %c0_8 = arith.constant 0 : index
    %8 = vector.load %arg6[%c0_6, %c0_7, %c0_8] : memref<1x8x32xf32, #tpu.memory_space<vmem>>, vector<1x8x32xf32>
    %9 = vector.shape_cast %8 : vector<1x8x32xf32> to vector<8x32xf32>
    %10 = vector.shape_cast %7 : vector<8x32xf32> to vector<1x8x32xf32>
    tpu.vector_store %arg6[%c0_6, %c0_7, %c0_8], %10 {strides = array<i32>} : memref<1x8x32xf32, #tpu.memory_space<vmem>>, vector<1x8x32xf32>,
    return
  }
  func.func @transform_0(%arg0: i32, %arg1: i32, %arg2: i32) -> (i32, i32, i32) {
    %c0_i32 = arith.constant 0 : i32
    %c0_i32_0 = arith.constant 0 : i32
    return %arg0, %arg2, %c0_i32 : i32, i32, i32
  }
  func.func @transform_1(%arg0: i32, %arg1: i32, %arg2: i32) -> (i32, i32) {
    %c0_i32 = arith.constant 0 : i32
    %c0_i32_0 = arith.constant 0 : i32
    return %c0_i32, %arg1 : i32, i32
  }
  func.func @transform_2(%arg0: i32, %arg1: i32, %arg2: i32) -> (i32, i32) {
    %c0_i32 = arith.constant 0 : i32
    %c0_i32_0 = arith.constant 0 : i32
    return %c0_i32, %arg1 : i32, i32
  }
  func.func @transform_3(%arg0: i32, %arg1: i32, %arg2: i32) -> (i32, i32, i32) {
    %c0_i32 = arith.constant 0 : i32
    return %arg0, %arg2, %arg1 : i32, i32, i32
  }
}

</mosaic_0001>

<bundles_post_ra>
// kernel: tpu_custom_call.1
= control target key start
LH: loop header
LB: loop body
LE: loop exit
PB: predicated region body
PF: predicated region fallthrough
CT: control target
= control target key end

     0   :  { %8 = vsyncpa [#allocation3], 0  ;;  %s851_s0 = inlined_call_operand.hbm [shape: f32[2,8,32], index: 0, kind: input, shape index: {}]   ;;  %s852_s1 = inlined_call_operand.hbm [shape: bf16[32,32], index: 1, kind: input, shape index: {}]   ;;  %s853_s2 = inlined_call_operand.vmem [shape: f32[1,32], index: 2, kind: input, shape index: {}]   ;;  %s854_s3 = inlined_call_operand.vmem [shape: f32[2,7,32], index: 3, kind: output, shape index: {}]  }
   0x1   :  { %10 = vsyncpa [#allocation3 + $0x1], 0 }
   0x2   :  { %11 = vsyncpa [#allocation5], 0  ;;  %s693_s12 = smov 0   ;;  %s695_s13 = smov 0  }
   0x3   :  { %s697_s14 = smov 0   ;;  %s699_s15 = smov 0  }
   0x4   :  { %s701_s16 = smov 0   ;;  %s703_s17 = smov 0  }
   0x5 LB: > { %s452_s18 = sadd.s32 4294967295, %s665_s17   ;;  %p58_p0 = scmp.ne.s32.totalorder %s649_s13, %s645_s12  ;;  %s665_s17 = sphi %s703_s17, %s17_s17   ;;  %s661_s16 = sphi %s701_s16, %s871_s16   ;;  %s657_s15 = sphi %s699_s15, %s870_s15   ;;  %s653_s14 = sphi %s697_s14, %s869_s14   ;;  %s649_s13 = sphi %s695_s13, %s868_s13   ;;  %s645_s12 = sphi %s693_s12, %s867_s12  }
   0x6   : > { %p723_p1 = scmp.eq.s32.totalorder %s452_s18, 0  ;;  %p454_p2 = scmp.ge.s32.totalorder %s665_s17, 1 }
   0x7   : > { %p151_p3 = scmp.lt.s32.totalorder %s665_s17, 3  ;;  %s667_s22 = smov [#allocation4]  }
   0x8   : > { %s859_s19 = scalar_select %p723_p1, 1, 0 }
   0x9   : > { %p731_p4 = por %p723_p1, %p58_p0  ;;  %p735_p5 = pnand %p454_p2, %p151_p3 }
   0xa   : > { %s165_s23 = sshll.u32 %s667_s22, 4  ;;  %s36_s25 = sadd.s32 1, %s661_s16  ;;  %s166_s23 = int_to_ptr.vmem [resolvable:$true] %s165_s23 }
   0xb   : > { %s860_s20 = scalar_select %p731_p4, 1, 0 }
   0xc   : > { %s861_s21 = scalar_select %p735_p5, 1, 0 }
   0xd   : > { %p487_p6 = pneg %p735_p5  ;;  %s553_s28 = scalar_lea.hbm %s852_s1, 256 }
   0xe   : > { %p554_p8 = scmp.ne.s32.totalorder %s852_s1, %s553_s28  ;;  %p560_p12 = scmp.lt.u32.totalorder %s553_s28, %s852_s1 }
   0xf   : > { %p743_p7 = pnand %p487_p6, %p723_p1 }
  0x11   : > { %p555_p9 = pneg %p743_p7 }
  0x13   : > { %p556_p10 = pnand %p555_p9, %p554_p8 }
  0x15   : > { %p557_p11 = pneg %p556_p10 }
  0x17   : > { %p562_p13 = pnand %p560_p12, %p557_p11 }
  0x19   : > { %565 = shalt.err (!%p562_p13)
}
  0x1a   : > { %s566_s6 = scalar_lea.vmem %s166_s23, 256  ;;  %p574_p6 = scmp.lt.s32.totalorder %s166_s23, %s166_s23 }
  0x1b   : > { %p567_p0 = scmp.ne.s32.totalorder %s166_s23, %s566_s6  ;;  %p575_p1 = scmp.lt.s32.totalorder %s566_s6, %s566_s6 }
  0x1d   : > { %p569_p2 = pnand %p567_p0, %p555_p9  ;;  %p576_p4 = por %p575_p1, %p574_p6 }
  0x1f   : > { %p570_p3 = pneg %p569_p2 }
  0x21   : > { %p577_p5 = pnand %p576_p4, %p570_p3 }
  0x23   : > { %580 = shalt.err (!%p577_p5)
}
  0x24   : > { %s668_s7 = smov 64   ;;  %s669_s8 = smov 4  }
  0x25   : > { %490 = dma.hbm_to_vmem [thread:$0]  (!%p743_p7), %s852_s1, 256, %s166_s23, [#allocation5], %s668_s7, %s668_s7, %s669_s8  }
  0x26   : > { %p38_p1 = scmp.ge.s32.totalorder %s36_s25, 2  ;;  %s45_s11 = sadd.s32 1, %s653_s14 }
  0x27   : > { %p52_p4 = scmp.ne.s32.totalorder %s653_s14, %s649_s13  ;;  %p53_p5 = scmp.eq.s32.totalorder %s665_s17, 0 }
  0x28   : > { %s873_s25 = smov (%p38_p1, %s36_s25), 0  ;;  %p496_p9 = scmp.lt.s32.totalorder %s665_s17, 2 }
  0x29   : > { %p54_p8 = por %p53_p5, %p52_p4  ;;  %s40_s12 = ssub.s32 %s661_s16, %s873_s25 }
  0x2a   : > { %s185_s18 = sand.u32 1, %s653_s14   ;;  %p43_p10 = scmp.eq.s32.totalorder %s40_s12, 0 }
  0x2b   : > { %s458_s22 = sshll.u32 %s185_s18, 3  ;;  %s459_s26 = sshll.u32 %s661_s16, 7 }
  0x2c   : > { %s776_s27 = scalar_select %p43_p10, %s653_s14, %s45_s11  }
  0x2d   : > { %s781_s23 = scalar_lea.hbm %s851_s0, %s459_s26  ;;  %s189_s29 = scalar_lea.vmem [#allocation2], %s458_s22 }
  0x2e   : > { %s197_s30 = sshll.u32 %s189_s29, 4  ;;  %p783_p7 = pnand %p496_p9, %p54_p8  ;;  %s787_s30 = int_to_ptr.vmem [resolvable:$true] %s197_s30 }
  0x2f   : > { %s186_s5 = scalar_lea.sflag [#allocation3], %s185_s18  ;;  %s581_s6 = scalar_lea.hbm %s781_s23, 128 }
  0x30   : > { %p582_p11 = scmp.ne.s32.totalorder %s781_s23, %s581_s6  ;;  %p583_p12 = pneg %p783_p7 }
  0x31   : > { %s586_s9 = scalar_lea.hbm %s851_s0, 256  ;;  %p587_p2 = scmp.lt.u32.totalorder %s781_s23, %s851_s0 }
  0x32   : > { %p584_p13 = pnand %p583_p12, %p582_p11  ;;  %p588_p3 = scmp.lt.u32.totalorder %s586_s9, %s581_s6 }
  0x33   : > { %p590_p1 = scmp.lt.u32.totalorder %s581_s6, %s781_s23 }
  0x34   : > { %p585_p0 = pneg %p584_p13  ;;  %p589_p6 = por %p588_p3, %p587_p2 }
  0x36   : > { %p591_p4 = por %p590_p1, %p589_p6 }
  0x38   : > { %p592_p5 = pnand %p591_p4, %p585_p0 }
  0x3a   : > { %595 = shalt.err (!%p592_p5)
}
  0x3b   : > { %s596_s12 = scalar_lea.vmem %s787_s30, 128  ;;  %s670_s18 = smov [#allocation2]  }
  0x3c   : > { %p597_p8 = scmp.ne.s32.totalorder %s787_s30, %s596_s12  ;;  %s601_s22 = sshll.u32 %s670_s18, 4  ;;  %s602_s22 = int_to_ptr.vmem [resolvable:$false] %s601_s22 }
  0x3d   : > { %s603_s26 = scalar_lea.vmem %s602_s22, 256  ;;  %p604_p11 = scmp.lt.s32.totalorder %s787_s30, %s602_s22 }
  0x3e   : > { %p599_p9 = pnand %p597_p8, %p583_p12  ;;  %p605_p13 = scmp.lt.s32.totalorder %s603_s26, %s596_s12 }
  0x40   : > { %p600_p10 = pneg %p599_p9  ;;  %p606_p2 = por %p605_p13, %p604_p11 }
  0x42   : > { %p607_p3 = pnand %p606_p2, %p600_p10 }
  0x44   : > { %610 = shalt.err (!%p607_p3)
}
  0x45   : > { %494 = dma.hbm_to_vmem [thread:$0]  (!%p783_p7), %s781_s23, 128, %s787_s30, %s186_s5  }
  0x46   : > { %p864_p0 = scmp.ne.s32.totalorder %s861_s21, 0 }
  0x47   : > { %s208_s24 = sand.u32 (!%p864_p0), 1, %s649_s13   ;;  %p865_p12 = scmp.ne.s32.totalorder (!%p864_p0), %s860_s20, 0 }
  0x48   : > { %206 = sbr.rel (%p864_p0) target bundleno = 307 (0x133), region = 32  ;;  %s461_s28 = sshll.u32 (!%p864_p0), %s208_s24, 3 }
  0x49   : > { %s209_s29 = scalar_lea.sflag (!%p864_p0), [#allocation3], %s208_s24  ;;  %s212_s6 = scalar_lea.vmem (!%p864_p0), [#allocation2], %s461_s28 }
  0x4f   : > { %636 = dma.done.wait (%p865_p12), %s209_s29, 128  }
  0x50   : > { %638 = vsyncadd (%p865_p12), %s209_s29, 4294967168  ;;  %p866_p6 = scmp.ne.s32.totalorder %s859_s19, 0 }
  0x52   : > { %640 = dma.done.wait (%p866_p6), [#allocation5], 256  }
  0x53   : > { %642 = vsyncadd (%p866_p6), [#allocation5], 4294967040  ;;  %v671_v0 = vmov 0.0   ;;  %vm672_vm0 = vmmov 0   ;;  %v551_v1 = vld [vmem:[#allocation4] sm:$0xff]   ;;  %v552_v2 = vld [vmem:[#allocation4 + $0x8] sm:$0xff]  }
  0x54   : > { %473 = vmatprep.subr.bf16.mxu0 %v671_v0  ;;  %477 = vmatprep.mubr.msk.bf16.mxu0 %vm672_vm0, %v671_v0  ;;  %v261_v3 = vld [vmem:[%s212_s6] sm:$0xff]  ;;  %vm286_vm1 = vcmask 261120   ;;  %p250_p7 = scmp.lt.s32.totalorder %s657_s15, 1  ;;  %v464_v5 = vld [vmem:[%s853_s2] ss:$0 sm:$0xff] }
  0x55   : > { %474 = vmatpush3.bf16.msra.mxu0 %v551_v1  ;;  %v262_v4 = vpack.c.bf16 %v261_v3, %v261_v3 }
  0x56   : > { %475 = vmatprep.subr.bf16.mxu0 %v671_v0  ;;  %s875_s15 = smov (!%p250_p7, %s657_s15), 1 }
  0x57   : > { %s463_s20 = sshll.u32 %s875_s15, 3 }
  0x58   : > { %s259_s4 = scalar_lea.vmem %s854_s3, %s463_s20 }
  0x59   : > { %476 = vmatpush3.bf16.msra.mxu0 %v552_v2 }
  0x5c   : > { %478 = vmatmul.mubr.msk.bf16.vlgmr.msra.gmra.mrb[0].mxu0 %vm286_vm1, %v262_v4 }
 0x12f   : > { %v324_v6 = vpop.f32.mrb[0].mxu0 }
 0x130   : > { %v325_v7 = vadd.f32 %v464_v5, %v324_v6  ;;  %v479_v8 = vpop.f32.mrb[1].mxu0 }
 0x131   : > { %v327_v9 = vpop.f32.mrb[2].mxu0 }
 0x132   : > { %330 = vst.msk [vmem:[%s259_s4] sm:$0xff] %vm286_vm1, %v325_v7  ;;  %v480_v10 = vpop.f32.mrb[3].mxu0 }
 0x133 PF: > { %s17_s17 = sadd.s32 1, %s665_s17   ;;  %s867_s12 = smov %s649_s13 }
 0x134   : > { %p14_p1 = scmp.ge.s32.totalorder %s17_s17, 4   ;;  %s868_s13 = smov %s653_s14 }
 0x135   : > { %s869_s14 = smov %s776_s27  ;;  %s870_s15 = smov %s661_s16 }
 0x136   : > { %s871_s16 = smov %s873_s25  ;;  %16 = sbr.rel (!%p14_p1) target bundleno = 5 (0x5), region = 80 }
 0x13d   :  { %362 = vsyncpa [#allocation3], 1 }
 0x13e   :  { %364 = vsyncpa [#allocation3 + $0x1], 1 }
 0x13f   :  { %365 = vsyncpa [#allocation5], 1 }

</bundles_post_ra>
